<compile_context>
chip_gen: v5e
topology: v5e:2x2
jax: 0.10.0
libtpu: 0.0.40
codegen_flags: <defaults>
</compile_context>

<pallas_src>
import jax
import jax.numpy as jnp
from jax.experimental import pallas as pl
from jax.experimental.pallas import tpu as pltpu


def rezero_ff_kernel(g_ref, x_ref, w1_ref, b1_ref, w2_ref, b2_ref, o_ref, acc_ref):
    # g_ref: SMEM scalar; x/w1/b1/w2/b2/o: VMEM tiles; acc: f32 VMEM scratch.
    j = pl.program_id(1)  # hidden-dim (reduction) axis, innermost / "arbitrary"

    @pl.when(j == 0)
    def _init():
        acc_ref[...] = jnp.zeros_like(acc_ref)

    # First matmul: bf16 operands on the MXU, f32 accumulation.
    h = jnp.dot(x_ref[...], w1_ref[...], preferred_element_type=jnp.float32)
    # (1, th) bias broadcasts over the tm rows — no explicit broadcast_to.
    h = h + b1_ref[...]
    h = jax.nn.gelu(h, approximate=True)  # tanh GELU (EUP); matches ref below

    # Second matmul: cast activations back to bf16 for the MXU, accumulate f32.
    acc_ref[...] += jnp.dot(h.astype(w2_ref.dtype), w2_ref[...],
                            preferred_element_type=jnp.float32)

    @pl.when(j == pl.num_programs(1) - 1)
    def _finalize():
        y = acc_ref[...] + b2_ref[...]
        # ReZero: scale the wrapped-fn output by the learnable scalar g.
        o_ref[...] = (y * g_ref[0]).astype(o_ref.dtype)


def _round_up(x, m):
    return (x + m - 1) // m * m


def rezero_feedforward(x, g, w1, b1, w2, b2, *, tm=256, th=None):
    """(GELU(x @ w1 + b1) @ w2 + b2) * g.

    x: [M, D] (bf16 or f32), w1: [D, H], w2: [H, D] (bf16 preferred),
    b1: [1, H] f32, b2: [1, D] f32, g: [1] f32.  Returns [M, D] in x.dtype.
    """
    M, D = x.shape
    H = w1.shape[1]

    # Token tile: big enough to feed the MXU M dimension; multiple of the
    # sublane packing for the input dtype (16 rows for bf16, 8 for f32).
    align = 16 if x.dtype == jnp.bfloat16 else 8
    tm = max(align, min(tm, _round_up(M, align)))
    Mp = _round_up(M, tm)
    if Mp != M:
        x = jnp.pad(x, ((0, Mp - M), (0, 0)))  # ragged-M handling

    # Hidden tile: whole FFN resident when it fits comfortably in VMEM,
    # otherwise stream H in 2048-wide chunks (v7x 64 MiB budget).
    if th is None:
        weight_bytes = (w1.size * w1.dtype.itemsize + w2.size * w2.dtype.itemsize)
        th = H if weight_bytes <= 24 * 1024 * 1024 else 2048
    assert H % th == 0, "hidden dim must be divisible by the hidden tile th"

    grid = (Mp // tm, H // th)

    flops = 4 * Mp * D * H  # two matmuls
    bytes_accessed = (
        Mp * D * x.dtype.itemsize              # x
        + w1.size * w1.dtype.itemsize + w2.size * w2.dtype.itemsize
        + b1.size * b1.dtype.itemsize + b2.size * b2.dtype.itemsize
        + Mp * D * x.dtype.itemsize)           # out

    out = pl.pallas_call(
        rezero_ff_kernel,
        out_shape=jax.ShapeDtypeStruct((Mp, D), x.dtype),
        grid_spec=pltpu.PrefetchScalarGridSpec(
            num_scalar_prefetch=0,
            grid=grid,
            in_specs=[
                pl.BlockSpec(memory_space=pltpu.SMEM),        # g (scalar)
                pl.BlockSpec((tm, D), lambda i, j: (i, 0)),   # x row tile
                pl.BlockSpec((D, th), lambda i, j: (0, j)),   # W1 H-chunk
                pl.BlockSpec((1, th), lambda i, j: (0, j)),   # b1 H-chunk
                pl.BlockSpec((th, D), lambda i, j: (j, 0)),   # W2 H-chunk
                pl.BlockSpec((1, D), lambda i, j: (0, 0)),    # b2
            ],
            out_specs=pl.BlockSpec((tm, D), lambda i, j: (i, 0)),
            scratch_shapes=[pltpu.VMEM((tm, D), jnp.float32)],  # f32 accumulator
        ),
        compiler_params=pltpu.CompilerParams(
            # Token axis parallel (megacore on v7x), H reduction axis arbitrary.
            dimension_semantics=("parallel", "arbitrary"),
            vmem_limit_bytes=64 * 1024 * 1024,
        ),
        cost_estimate=pl.CostEstimate(
            flops=flops,
            transcendentals=Mp * H,          # one tanh per hidden activation
            bytes_accessed=bytes_accessed,
        ),
    )(g, x, w1, b1, w2, b2)

    return out[:M] if Mp != M else out


def rezero_feedforward_ref(x, g, w1, b1, w2, b2):
    h = jax.nn.gelu(x @ w1 + b1, approximate=True)
    return (h @ w2 + b2) * g[0]


if __name__ == "__main__":
    # Small shapes: batch=2, seq=8, dim=128 (lane-dense), ff mult=4 -> hidden=512.
    B, S, D, H = 2, 8, 128, 512
    key = jax.random.PRNGKey(0)
    kx, k1, k2, kb1, kb2 = jax.random.split(key, 5)

    x = jax.random.normal(kx, (B, S, D), dtype=jnp.float32)

    # Deterministic parameter init (synthetic; shapes from the module).
    g = jnp.array([0.001], dtype=jnp.float32)                 # nn.Parameter(torch.tensor(0.001))
    w1 = jax.random.normal(k1, (D, H), dtype=jnp.float32) * (1.0 / D ** 0.5)
    b1 = jax.random.normal(kb1, (1, H), dtype=jnp.float32) * 0.02
    w2 = jax.random.normal(k2, (H, D), dtype=jnp.float32) * (1.0 / H ** 0.5)
    b2 = jax.random.normal(kb2, (1, D), dtype=jnp.float32) * 0.02

    # bf16 matmul operands (MXU-native); biases / scale / accumulation stay f32.
    x2d = x.reshape(B * S, D).astype(jnp.bfloat16)
    w1_bf = w1.astype(jnp.bfloat16)
    w2_bf = w2.astype(jnp.bfloat16)

    # th=128 in the demo exercises the H-tiled accumulator path (4 chunks).
    out = rezero_feedforward(x2d, g, w1_bf, b1, w2_bf, b2, th=128)
    out = jax.block_until_ready(out)

    # f32 reference computed from the same bf16-rounded operands.
    ref = rezero_feedforward_ref(
        x2d.astype(jnp.float32), g,
        w1_bf.astype(jnp.float32), b1, w2_bf.astype(jnp.float32), b2)

    assert out.shape == (B * S, D)
    assert out.dtype == jnp.bfloat16
    err = float(jnp.max(jnp.abs(out.astype(jnp.float32) - ref)))
    assert jnp.allclose(out.astype(jnp.float32), ref, atol=5e-4, rtol=5e-2), (
        f"mismatch vs JAX reference (max abs err={err})")

    out3d = out.reshape(B, S, D)  # back to [batch, seq, dim]
    del out3d
    print("KERNEL_OK")
</pallas_src>

<mosaic_0001>
module attributes {stable_mosaic.version = 11 : i64} {
  func.func @rezero_ff_kernel(%arg0: i32, %arg1: i32, %arg2: memref<1xf32, #tpu.memory_space<smem>>, %arg3: memref<16x128xbf16, #tpu.memory_space<vmem>>, %arg4: memref<128x128xbf16, #tpu.memory_space<vmem>>, %arg5: memref<1x128xf32, #tpu.memory_space<vmem>>, %arg6: memref<128x128xbf16, #tpu.memory_space<vmem>>, %arg7: memref<1x128xf32, #tpu.memory_space<vmem>>, %arg8: memref<16x128xbf16, #tpu.memory_space<vmem>>, %arg9: memref<16x128xf32, #tpu.memory_space<vmem>>) attributes {dimension_semantics = [#tpu.dimension_semantics<parallel>, #tpu.dimension_semantics<arbitrary>], iteration_bounds = array<i64: 1, 4>, scalar_prefetch = 0 : i64, scratch_operands = 1 : i64, tpu.core_type = #tpu.core_type<tc>, window_params = [{transform_indices = @transform_0, window_bounds = array<i64: 1>}, {transform_indices = @transform_1, window_bounds = array<i64: 16, 128>}, {transform_indices = @transform_2, window_bounds = array<i64: 128, 128>}, {transform_indices = @transform_3, window_bounds = array<i64: 1, 128>}, {transform_indices = @transform_4, window_bounds = array<i64: 128, 128>}, {pipeline_mode = #tpu.pipeline_mode<synchronous>, transform_indices = @transform_5, window_bounds = array<i64: 1, 128>}, {transform_indices = @transform_6, window_bounds = array<i64: 16, 128>}]} {
    %c0_i32 = arith.constant 0 : i32
    %0 = arith.cmpi eq, %arg1, %c0_i32 : i32
    %1 = arith.extui %0 : i1 to i32
    %c0_i32_0 = arith.constant 0 : i32
    %2 = arith.cmpi ne, %1, %c0_i32_0 : i32
    scf.if %2 {
      %cst_18 = arith.constant 0.000000e+00 : f32
      %31 = vector.broadcast %cst_18 : f32 to vector<16x128xf32>
      %c0_19 = arith.constant 0 : index
      %c0_20 = arith.constant 0 : index
      %32 = vector.load %arg9[%c0_19, %c0_20] : memref<16x128xf32, #tpu.memory_space<vmem>>, vector<16x128xf32>
      tpu.vector_store %arg9[%c0_19, %c0_20], %31 {strides = array<i32>} : memref<16x128xf32, #tpu.memory_space<vmem>>, vector<16x128xf32>,
    } else {
    }
    %c0 = arith.constant 0 : index
    %c0_1 = arith.constant 0 : index
    %3 = vector.load %arg3[%c0, %c0_1] : memref<16x128xbf16, #tpu.memory_space<vmem>>, vector<16x128xbf16>
    %c0_2 = arith.constant 0 : index
    %c0_3 = arith.constant 0 : index
    %4 = vector.load %arg4[%c0_2, %c0_3] : memref<128x128xbf16, #tpu.memory_space<vmem>>, vector<128x128xbf16>
    %cst = arith.constant dense<0.000000e+00> : vector<16x128xf32>
    %5 = tpu.matmul %3, %4, %cst {dimension_numbers = #tpu.dot_dimension_numbers<[1], [0], [0], [1], [0, 0, 1, 1], [], []>} : vector<16x128xbf16>, vector<128x128xbf16>, vector<16x128xf32> -> vector<16x128xf32>
    %c0_4 = arith.constant 0 : index
    %c0_5 = arith.constant 0 : index
    %6 = vector.load %arg5[%c0_4, %c0_5] : memref<1x128xf32, #tpu.memory_space<vmem>>, vector<1x128xf32>
    %7 = vector.broadcast %6 : vector<1x128xf32> to vector<16x128xf32>
    %8 = arith.addf %5, %7 : vector<16x128xf32>
    %9 = arith.mulf %8, %8 : vector<16x128xf32>
    %10 = arith.mulf %8, %9 : vector<16x128xf32>
    %cst_6 = arith.constant 4.471500e-02 : f32
    %11 = vector.broadcast %cst_6 : f32 to vector<16x128xf32>
    %12 = arith.mulf %11, %10 : vector<16x128xf32>
    %13 = arith.addf %8, %12 : vector<16x128xf32>
    %cst_7 = arith.constant 0.797884583 : f32
    %14 = vector.broadcast %cst_7 : f32 to vector<16x128xf32>
    %15 = arith.mulf %14, %13 : vector<16x128xf32>
    %16 = math.tanh %15 : vector<16x128xf32>
    %cst_8 = arith.constant 1.000000e+00 : f32
    %17 = vector.broadcast %cst_8 : f32 to vector<16x128xf32>
    %18 = arith.addf %17, %16 : vector<16x128xf32>
    %cst_9 = arith.constant 5.000000e-01 : f32
    %19 = vector.broadcast %cst_9 : f32 to vector<16x128xf32>
    %20 = arith.mulf %19, %18 : vector<16x128xf32>
    %21 = arith.mulf %8, %20 : vector<16x128xf32>
    %c0_10 = arith.constant 0 : index
    %c0_11 = arith.constant 0 : index
    %22 = vector.load %arg9[%c0_10, %c0_11] : memref<16x128xf32, #tpu.memory_space<vmem>>, vector<16x128xf32>
    %23 = arith.truncf %21 : vector<16x128xf32> to vector<16x128xbf16>
    %c0_12 = arith.constant 0 : index
    %c0_13 = arith.constant 0 : index
    %24 = vector.load %arg6[%c0_12, %c0_13] : memref<128x128xbf16, #tpu.memory_space<vmem>>, vector<128x128xbf16>
    %cst_14 = arith.constant dense<0.000000e+00> : vector<16x128xf32>
    %25 = tpu.matmul %23, %24, %cst_14 {dimension_numbers = #tpu.dot_dimension_numbers<[1], [0], [0], [1], [0, 0, 1, 1], [], []>} : vector<16x128xbf16>, vector<128x128xbf16>, vector<16x128xf32> -> vector<16x128xf32>
    %26 = arith.addf %22, %25 : vector<16x128xf32>
    %c0_15 = arith.constant 0 : index
    %c0_16 = arith.constant 0 : index
    %27 = vector.load %arg9[%c0_15, %c0_16] : memref<16x128xf32, #tpu.memory_space<vmem>>, vector<16x128xf32>
    tpu.vector_store %arg9[%c0_15, %c0_16], %26 {strides = array<i32>} : memref<16x128xf32, #tpu.memory_space<vmem>>, vector<16x128xf32>,
    %c3_i32 = arith.constant 3 : i32
    %28 = arith.cmpi eq, %arg1, %c3_i32 : i32
    %29 = arith.extui %28 : i1 to i32
    %c0_i32_17 = arith.constant 0 : i32
    %30 = arith.cmpi ne, %29, %c0_i32_17 : i32
    scf.if %30 {
      %c0_18 = arith.constant 0 : index
      %c0_19 = arith.constant 0 : index
      %31 = vector.load %arg9[%c0_18, %c0_19] : memref<16x128xf32, #tpu.memory_space<vmem>>, vector<16x128xf32>
      %c0_20 = arith.constant 0 : index
      %c0_21 = arith.constant 0 : index
      %32 = vector.load %arg7[%c0_20, %c0_21] : memref<1x128xf32, #tpu.memory_space<vmem>>, vector<1x128xf32>
      %33 = vector.broadcast %32 : vector<1x128xf32> to vector<16x128xf32>
      %34 = arith.addf %31, %33 : vector<16x128xf32>
      %c0_22 = arith.constant 0 : index
      %35 = memref.load %arg2[%c0_22] : memref<1xf32, #tpu.memory_space<smem>>
      %36 = vector.broadcast %35 : f32 to vector<16x128xf32>
      %37 = arith.mulf %34, %36 : vector<16x128xf32>
      %38 = arith.truncf %37 : vector<16x128xf32> to vector<16x128xbf16>
      %c0_23 = arith.constant 0 : index
      %c0_24 = arith.constant 0 : index
      %39 = vector.load %arg8[%c0_23, %c0_24] : memref<16x128xbf16, #tpu.memory_space<vmem>>, vector<16x128xbf16>
      tpu.vector_store %arg8[%c0_23, %c0_24], %38 {strides = array<i32>} : memref<16x128xbf16, #tpu.memory_space<vmem>>, vector<16x128xbf16>,
    } else {
    }
    return
  }
  func.func @transform_0(%arg0: i32, %arg1: i32) -> i32 {
    %c0_i32 = arith.constant 0 : i32
    %c0_i32_0 = arith.constant 0 : i32
    return %c0_i32 : i32
  }
  func.func @transform_1(%arg0: i32, %arg1: i32) -> (i32, i32) {
    %c0_i32 = arith.constant 0 : i32
    %c0_i32_0 = arith.constant 0 : i32
    return %arg0, %c0_i32 : i32, i32
  }
  func.func @transform_2(%arg0: i32, %arg1: i32) -> (i32, i32) {
    %c0_i32 = arith.constant 0 : i32
    %c0_i32_0 = arith.constant 0 : i32
    return %c0_i32, %arg1 : i32, i32
  }
  func.func @transform_3(%arg0: i32, %arg1: i32) -> (i32, i32) {
    %c0_i32 = arith.constant 0 : i32
    %c0_i32_0 = arith.constant 0 : i32
    return %c0_i32, %arg1 : i32, i32
  }
  func.func @transform_4(%arg0: i32, %arg1: i32) -> (i32, i32) {
    %c0_i32 = arith.constant 0 : i32
    %c0_i32_0 = arith.constant 0 : i32
    return %arg1, %c0_i32 : i32, i32
  }
  func.func @transform_5(%arg0: i32, %arg1: i32) -> (i32, i32) {
    %c0_i32 = arith.constant 0 : i32
    %c0_i32_0 = arith.constant 0 : i32
    %c0_i32_1 = arith.constant 0 : i32
    return %c0_i32, %c0_i32_0 : i32, i32
  }
  func.func @transform_6(%arg0: i32, %arg1: i32) -> (i32, i32) {
    %c0_i32 = arith.constant 0 : i32
    %c0_i32_0 = arith.constant 0 : i32
    return %arg0, %c0_i32 : i32, i32
  }
}

</mosaic_0001>

<bundles_post_ra>
// kernel: tpu_custom_call.1
= control target key start
LH: loop header
LB: loop body
LE: loop exit
PB: predicated region body
PF: predicated region fallthrough
CT: control target
= control target key end

     0   :  { %s1368_s0 = inlined_call_operand.<no memory space> [shape: f32[1], index: 0, kind: input, shape index: {}]   ;;  %s1369_s1 = inlined_call_operand.hbm [shape: bf16[16,128], index: 1, kind: input, shape index: {}]   ;;  %s1370_s2 = inlined_call_operand.hbm [shape: bf16[128,512], index: 2, kind: input, shape index: {}]   ;;  %s1371_s3 = inlined_call_operand.hbm [shape: f32[1,512], index: 3, kind: input, shape index: {}]   ;;  %s1372_s4 = inlined_call_operand.hbm [shape: bf16[512,128], index: 4, kind: input, shape index: {}]   ;;  %s1373_s5 = inlined_call_operand.vmem [shape: f32[1,128], index: 5, kind: input, shape index: {}]   ;;  %s1374_s6 = inlined_call_operand.hbm [shape: bf16[16,128], index: 6, kind: output, shape index: {}]  }
   0x1   :  { %1376 = sst [smem:[#allocation18_spill]] %s1369_s1 }
   0x2   :  { %1377 = sst [smem:[#allocation19_spill]] %s1370_s2 }
   0x3   :  { %1378 = sst [smem:[#allocation20_spill]] %s1371_s3 }
   0x4   :  { %11 = sst [smem:[#allocation3]] %s1368_s0 }
   0x5   :  { %12 = vsyncpa [#allocation5], 0 }
   0x6   :  { %13 = vsyncpa [#allocation8], 0 }
   0x7   :  { %15 = vsyncpa [#allocation8 + $0x1], 0 }
   0x8   :  { %16 = vsyncpa [#allocation11], 0 }
   0x9   :  { %18 = vsyncpa [#allocation11 + $0x1], 0 }
   0xa   :  { %19 = vsyncpa [#allocation6], 0  ;;  %s1189_s23 = smov 0   ;;  %s1191_s24 = smov 0  }
   0xb   :  { %s1193_s25 = smov 0   ;;  %s1195_s26 = smov 0  }
   0xc   :  { %s1197_s27 = smov 0   ;;  %s1199_s28 = smov 0  }
   0xd LB: > { %s34_s0 = sadd.s32 1, %s1137_s27  ;;  %s91_s29 = sadd.s32 1, %s1129_s25  ;;  %s1141_s28 = sphi %s1199_s28, %s25_s28   ;;  %s1137_s27 = sphi %s1197_s27, %s1392_s27   ;;  %s1133_s26 = sphi %s1195_s26, %s1391_s26   ;;  %s1129_s25 = sphi %s1193_s25, %s1390_s25   ;;  %s1125_s24 = sphi %s1191_s24, %s1389_s24   ;;  %s1121_s23 = sphi %s1189_s23, %s1388_s23  }
   0xe   : > { %p35_p0 = scmp.ge.s32.totalorder %s34_s0, 4  ;;  %p98_p1 = scmp.ne.s32.totalorder %s1129_s25, %s1125_s24 }
   0xf   : > { %p99_p2 = scmp.eq.s32.totalorder %s1141_s28, 0  ;;  %p865_p5 = scmp.lt.s32.totalorder %s1141_s28, 4 }
  0x10   : > { %s1394_s0 = smov (%p35_p0, %s34_s0), 0  ;;  %s250_s8 = sand.u32 1, %s1141_s28  }
  0x11   : > { %1379 = sst [smem:[#allocation17_spill]] %s1394_s0  ;;  %p1226_p3 = por %p99_p2, %p98_p1 }
  0x12   : > { %s88_s7 = ssub.s32 %s1137_s27, %s1394_s0  ;;  %s1235_s9 = sand.u32 1, %s1129_s25  }
  0x13   : > { %p89_p4 = scmp.eq.s32.totalorder %s88_s7, 0  ;;  %s730_s11 = sshll.u32 %s1235_s9, 6 }
  0x14   : > { %s731_s12 = sshll.u32 %s1137_s27, 2  ;;  %s1381_s2 = sld [smem:[#allocation19_spill]] }
  0x15   : > { %s1238_s10 = scalar_select %p89_p4, %s1129_s25, %s91_s29  }
  0x16   : > { %s254_s16 = scalar_lea.vmem [#allocation7], %s730_s11  ;;  %p1249_p6 = pnand %p865_p5, %p1226_p3 }
  0x17   : > { %s261_s17 = sshll.u32 %s254_s16, 4  ;;  %s1253_s20 = scalar_lea.sflag [#allocation8], %s250_s8  ;;  %s262_s17 = int_to_ptr.vmem [resolvable:$true] %s261_s17 }
  0x18   : > { %s1143_s21 = smov 256   ;;  %s1144_s22 = smov 64  }
  0x19   : > { %s1145_s29 = smov 4   ;;  %s1261_s7 = sadd.s32 4294967295, %s1141_s28  }
  0x1a   : > { %s258_s15 = scalar_lea.hbm %s1381_s2, %s731_s12  ;;  %p104_p7 = scmp.ne.s32.totalorder %s1125_s24, %s1121_s23 }
  0x1b   : > { %s259_s18 = sshll.u32 %s258_s15, 4  ;;  %p105_p8 = scmp.eq.s32.totalorder %s1261_s7, 0  ;;  %s260_s18 = int_to_ptr.hbm [resolvable:$true] %s259_s18 }
  0x1c   : > { %857 = dma.hbm_to_vmem [thread:$0]  (!%p1249_p6), %s260_s18, 1024, %s262_s17, %s1253_s20, %s1143_s21, %s1144_s22, %s1145_s29  }
  0x1d   : > { %p727_p9 = scmp.ge.s32.totalorder %s1141_s28, 1  ;;  %p214_p10 = scmp.lt.s32.totalorder %s1141_s28, 5 }
  0x1e   : > { %p1270_p11 = por %p105_p8, %p104_p7  ;;  %s1384_s1 = sld [smem:[#allocation18_spill]] }
  0x1f   : > { %p1277_p12 = pnand %p727_p9, %p214_p10  ;;  %s1146_s23 = smov [#allocation4]  }
  0x20   : > { %s233_s15 = sshll.u32 %s1146_s23, 4  ;;  %s1386_s3 = sld [smem:[#allocation20_spill]]  ;;  %s234_s15 = int_to_ptr.vmem [resolvable:$true] %s233_s15 }
  0x21   : > { %p850_p13 = pneg %p1277_p12  ;;  %s274_s8 = scalar_lea.vmem [#allocation9], %s1235_s9 }
  0x22   : > { %s281_s12 = sshll.u32 %s274_s8, 4  ;;  %s813_s23 = sshll.u32 %s1137_s27, 6  ;;  %s282_s12 = int_to_ptr.vmem [resolvable:$true] %s281_s12 }
  0x23   : > { %p851_p0 = pnand %p850_p13, %p105_p8  ;;  %s289_s0 = scalar_lea.sflag [#allocation11], %s1235_s9 }
  0x24   : > { %s231_s13 = sshll.u32 %s1384_s1, 4  ;;  %s292_s1 = scalar_lea.vmem [#allocation10], %s730_s11  ;;  %s232_s13 = int_to_ptr.hbm [resolvable:$true] %s231_s13 }
  0x25   : > { %853 = dma.hbm_to_vmem [thread:$0]  (!%p851_p0), %s232_s13, 128, %s234_s15, [#allocation5], %s1144_s22, %s1144_s22, %s1145_s29  }
  0x26   : > { %s277_s18 = scalar_lea.hbm %s1386_s3, %s1137_s27  ;;  %s300_s16 = sshll.u32 %s292_s1, 4  ;;  %s301_s16 = int_to_ptr.vmem [resolvable:$true] %s300_s16 }
  0x27   : > { %s279_s21 = sshll.u32 %s277_s18, 4  ;;  %s297_s3 = scalar_lea.hbm %s1372_s4, %s813_s23  ;;  %s280_s21 = int_to_ptr.hbm [resolvable:$true] %s279_s21 }
  0x28   : > { %860 = dma.hbm_to_vmem [thread:$0]  (!%p1249_p6), %s280_s21, 16, %s282_s12, %s1253_s20  }
  0x29   : > { %s298_s18 = sshll.u32 %s297_s3, 4  ;;  %312 = sbr.rel (%p1277_p12) target bundleno = 414 (0x19e), region = 44  ;;  %s299_s18 = int_to_ptr.hbm [resolvable:$true] %s298_s18 }
  0x2a   : > { %863 = dma.hbm_to_vmem [thread:$0]  (!%p1249_p6), %s299_s18, 1024, %s301_s16, %s289_s0, %s1144_s22, %s1144_s22, %s1145_s29  }
  0x2e   : > { %1104 = dma.done.wait (%p105_p8), [#allocation5], 128  }
  0x2f   : > { %1106 = vsyncadd (%p105_p8), [#allocation5], 4294967168  ;;  %s319_s1 = sand.u32 1, %s1261_s7   ;;  %s1316_s2 = sand.u32 1, %s1125_s24  }
  0x30   : > { %s737_s3 = sshll.u32 %s1316_s2, 6  ;;  %s320_s9 = scalar_lea.sflag [#allocation8], %s319_s1 }
  0x31   : > { %s323_s11 = scalar_lea.vmem [#allocation7], %s737_s3 }
  0x32   : > { %1108 = dma.done.wait (%p1270_p11), %s320_s9, 1040  }
  0x33   : > { %1110 = vsyncadd (%p1270_p11), %s320_s9, 4294966256  ;;  %s332_s0 = scalar_lea.vmem [#allocation9], %s1316_s2  ;;  %s339_s19 = scalar_lea.sflag [#allocation11], %s1316_s2 }
  0x34   : > { %s1325_s20 = scalar_lea.vmem [#allocation10], %s737_s3 }
  0x35   : > { %1112 = dma.done.wait (%p1270_p11), %s339_s19, 1024  }
  0x36   : > { %1114 = vsyncadd (%p1270_p11), %s339_s19, 4294966272  ;;  %p739_p1 = scmp.ne.s32.totalorder %s1133_s26, 0 }
  0x38   : > { %382 = sbr.rel (%p739_p1) target bundleno = 64 (0x40), region = 64 }
  0x3d   : > { %v1147_v0 = vmov 0.0  }
  0x3e   : > { %383 = vst [vmem:[#allocation2] sm:$0xff] %v1147_v0 }
  0x3f   : > { %384 = vst [vmem:[#allocation2 + $0x8] sm:$0xff] %v1147_v0 }
  0x40 PF: > { %v822_v1 = vld [vmem:[%s323_s11 + $0x38] sm:$0xff]  ;;  %v821_v2 = vld [vmem:[%s323_s11 + $0x30] sm:$0xff]  ;;  %v820_v3 = vld [vmem:[%s323_s11 + $0x28] sm:$0xff]  ;;  %p808_p2 = scmp.ne.s32.totalorder %s1133_s26, 3 }
  0x41   : > { %461 = vmatpush.bf16.msra.mxu0 %v822_v1  ;;  %v819_v4 = vld [vmem:[%s323_s11 + $0x20] sm:$0xff]  ;;  %v818_v5 = vld [vmem:[%s323_s11 + $0x18] sm:$0xff]  ;;  %v817_v6 = vld [vmem:[%s323_s11 + $0x10] sm:$0xff]  ;;  %s590_s22 = sld [smem:[#allocation3]] (!%p808_p2) }
  0x42   : > { %v816_v7 = vld [vmem:[%s323_s11 + $0x8] sm:$0xff]  ;;  %v815_v8 = vld [vmem:[%s323_s11] sm:$0xff]  ;;  %v814_v9 = vld [vmem:[#allocation4] sm:$0xff] }
  0x43   : > { %v830_v10 = vld [vmem:[%s1325_s20 + $0x38] sm:$0xff]  ;;  %v829_v11 = vld [vmem:[%s1325_s20 + $0x30] sm:$0xff]  ;;  %v828_v12 = vld [vmem:[%s1325_s20 + $0x28] sm:$0xff] }
  0x44   : > { %560 = vmatpush.bf16.msra.mxu1 %v830_v10  ;;  %v827_v13 = vld [vmem:[%s1325_s20 + $0x20] sm:$0xff]  ;;  %v826_v14 = vld [vmem:[%s1325_s20 + $0x18] sm:$0xff]  ;;  %v825_v15 = vld [vmem:[%s1325_s20 + $0x10] sm:$0xff] }
  0x45   : > { %462 = vmatpush.bf16.msra.mxu0 %v821_v2  ;;  %v824_v16 = vld [vmem:[%s1325_s20 + $0x8] sm:$0xff]  ;;  %v925_v17 = vld [vmem:[%s332_s0] ss:$0 sm:$0xff] }
  0x46   : > { %v823_v18 = vld [vmem:[%s1325_s20] sm:$0xff]  ;;  %v494_v45 = vld [vmem:[#allocation2 + $0x8] sm:$0xff] }
  0x47   : > { %v493_v42 = vld [vmem:[#allocation2] sm:$0xff] }
  0x48   : > { %561 = vmatpush.bf16.msra.mxu1 %v829_v11 }
  0x49   : > { %463 = vmatpush.bf16.msra.mxu0 %v820_v3 }
  0x4c   : > { %562 = vmatpush.bf16.msra.mxu1 %v828_v12 }
  0x4d   : > { %464 = vmatpush.bf16.msra.mxu0 %v819_v4 }
  0x50   : > { %563 = vmatpush.bf16.msra.mxu1 %v827_v13 }
  0x51   : > { %465 = vmatpush.bf16.msra.mxu0 %v818_v5 }
  0x54   : > { %564 = vmatpush.bf16.msra.mxu1 %v826_v14 }
  0x55   : > { %466 = vmatpush.bf16.msra.mxu0 %v817_v6 }
  0x58   : > { %565 = vmatpush.bf16.msra.mxu1 %v825_v15 }
  0x59   : > { %467 = vmatpush.bf16.msra.mxu0 %v816_v7 }
  0x5c   : > { %566 = vmatpush.bf16.msra.mxu1 %v824_v16 }
  0x5d   : > { %468 = vmatpush.bf16.msra.mxu0 %v815_v8 }
  0x60   : > { %469 = vmatmul.bf16.vlgmr.msra.gmra.mxu0 %v814_v9  ;;  %567 = vmatpush.bf16.msra.mxu1 %v823_v18 }
  0xdd   : > { %v470_v19 = vpop.f32.mrf.mxu0 }
  0xde   : > { %v471_v20 = vadd.f32 %v925_v17, %v470_v19 }
  0xe0   : > { %v475_v21 = vmul.f32 %v471_v20, %v471_v20 }
  0xe2   : > { %v477_v22 = vmul.f32 %v475_v21, %v471_v20 }
  0xe4   : > { %v479_v23 = vmul.f32 0.044715, %v477_v22 }
  0xe5   : > { %v472_v24 = vpop.f32.mrf.mxu0 }
  0xe6   : > { %v481_v25 = vadd.f32 %v479_v23, %v471_v20  ;;  %v473_v26 = vadd.f32 %v925_v17, %v472_v24 }
  0xe8   : > { %v476_v27 = vmul.f32 %v473_v26, %v473_v26  ;;  %v483_v28 = vmul.f32 0.7978846, %v481_v25 }
  0xea   : > { %v478_v29 = vmul.f32 %v476_v27, %v473_v26  ;;  %926 = vtanh.f32 %v483_v28 }
  0xec   : > { %v480_v30 = vmul.f32 0.044715, %v478_v29 }
  0xee   : > { %v482_v31 = vadd.f32 %v480_v30, %v473_v26 }
  0xf0   : > { %v484_v32 = vmul.f32 0.7978846, %v482_v31  ;;  %v927_v33 = vpop.eup %926 }
  0xf1   : > { %v487_v34 = vadd.f32 1.0, %v927_v33 }
  0xf2   : > { %928 = vtanh.f32 %v484_v32 }
  0xf3   : > { %v489_v37 = vmul.f32 0.5, %v487_v34 }
  0xf5   : > { %v491_v39 = vmul.f32 %v489_v37, %v471_v20 }
  0xf8   : > { %v929_v35 = vpop.eup %928 }
  0xf9   : > { %v488_v36 = vadd.f32 1.0, %v929_v35 }
  0xfb   : > { %v490_v38 = vmul.f32 0.5, %v488_v36 }
  0xfd   : > { %v492_v40 = vmul.f32 %v490_v38, %v473_v26 }
  0xff   : > { %v495_v41 = vpack.c.bf16 %v492_v40, %v491_v39 }
 0x101   : > { %568 = vmatmul.bf16.vlgmr.msra.gmra.mxu1 %v495_v41 }
 0x17e   : > { %v569_v43 = vpop.f32.mrf.mxu1 }
 0x17f   : > { %v574_v44 = vadd.f32 %v569_v43, %v493_v42 }
 0x181   : > { %576 = vst [vmem:[#allocation2] sm:$0xff] %v574_v44 }
 0x185   : > { %581 = sbr.rel (%p808_p2) target bundleno = 408 (0x198), region = 68 }
 0x186   : > { %v571_v46 = vpop.f32.mrf.mxu1 }
 0x187   : > { %v575_v47 = vadd.f32 %v571_v46, %v494_v45 }
 0x189   : > { %577 = vst [vmem:[#allocation2 + $0x8] sm:$0xff] %v575_v47 }
 0x18a   : > { %v582_v48 = vld [vmem:[#allocation2] sm:$0xff]  ;;  %v591_v53 = vstv %s590_s22 }
 0x18b   : > { %v930_v50 = vld [vmem:[%s1373_s5] ss:$0 sm:$0xff] }
 0x18c   : > { %v588_v51 = vadd.f32 %v930_v50, %v582_v48 }
 0x18e   : > { %v592_v54 = vmul.f32 %v591_v53, %v588_v51 }
 0x190   : > { %v583_v49 = vld [vmem:[#allocation2 + $0x8] sm:$0xff] }
 0x191   : > { %v589_v52 = vadd.f32 %v930_v50, %v583_v49 }
 0x193   : > { %v593_v55 = vmul.f32 %v591_v53, %v589_v52 }
 0x195   : > { %v834_v56 = vpack.c.bf16 %v593_v55, %v592_v54 }
 0x197   : > { %835 = vst [vmem:[#allocation12] sm:$0xff] %v834_v56  }
 0x198 PF: > { %p867_p3 = scmp.eq.s32.totalorder %s1261_s7, 3  ;;  %s608_s14 = sshll.u32 %s1374_s6, 4  ;;  %s609_s14 = int_to_ptr.hbm [resolvable:$true] %s608_s14 }
 0x199   : > { %s1148_s15 = smov [#allocation12]   ;;  %s1149_s8 = smov 64  }
 0x19a   : > { %s606_s21 = sshll.u32 %s1148_s15, 4  ;;  %s1150_s12 = smov 4   ;;  %s607_s21 = int_to_ptr.vmem [resolvable:$true] %s606_s21 }
 0x19b   : > { %847 = dma.vmem_to_hbm [thread:$0]  (%p867_p3), %s607_s21, 128, %s609_s14, [#allocation6], %s1149_s8, %s1149_s8, %s1150_s12  }
 0x19c   : > { %1116 = dma.done.wait (%p867_p3), [#allocation6], 128  }
 0x19d   : > { %1118 = vsyncadd (%p867_p3), [#allocation6], 4294967168 }
 0x19e PF: > { %s25_s28 = sadd.s32 1, %s1141_s28   ;;  %s1387_s7 = sld [smem:[#allocation17_spill]] }
 0x19f   : > { %p22_p4 = scmp.ge.s32.totalorder %s25_s28, 6   ;;  %s1388_s23 = smov %s1125_s24 }
 0x1a0   : > { %s1389_s24 = smov %s1129_s25  ;;  %s1390_s25 = smov %s1238_s10 }
 0x1a1   : > { %s1391_s26 = smov %s1137_s27  ;;  %24 = sbr.rel (!%p22_p4) target bundleno = 13 (0xd), region = 120 }
 0x1a4   : > { %s1392_s27 = smov %s1387_s7 }
 0x1a6   :  { %625 = vsyncpa [#allocation5], 1 }
 0x1a7   :  { %627 = vsyncpa [#allocation5 + $0x1], 1 }
 0x1a8   :  { %628 = vsyncpa [#allocation8], 1 }
 0x1a9   :  { %630 = vsyncpa [#allocation8 + $0x1], 1 }
 0x1aa   :  { %631 = vsyncpa [#allocation11], 1 }
 0x1ab   :  { %633 = vsyncpa [#allocation11 + $0x1], 1 }
 0x1ac   :  { %634 = vsyncpa [#allocation6], 1 }
 0x1ad   :  { %636 = vsyncpa [#allocation6 + $0x1], 1 }

</bundles_post_ra>
